<compile_context>
chip_gen: v7x
topology: tpu7x:2x2x1
jax: 0.10.0
libtpu: 0.0.40
codegen_flags: <defaults>
</compile_context>

<pallas_src>
import functools

import jax
import jax.numpy as jnp
from jax.experimental import pallas as pl
from jax.experimental.pallas import tpu as pltpu


# ----------------------------------------------------------------------------
# Pallas kernels: tiled  (patches @ W_folded)  ->  + bias [+ residual] [+ ReLU]
# ----------------------------------------------------------------------------
def _fused_kernel_nores(x_ref, w_ref, bias_ref, o_ref, acc_ref, *, apply_relu):
    @pl.when(pl.program_id(2) == 0)
    def _():
        acc_ref[...] = jnp.zeros_like(acc_ref)

    acc_ref[...] += jnp.dot(x_ref[...], w_ref[...],
                            preferred_element_type=jnp.float32)

    @pl.when(pl.program_id(2) == pl.num_programs(2) - 1)
    def _():
        out = acc_ref[...] + bias_ref[...]
        if apply_relu:
            out = jnp.maximum(out, 0.0)
        o_ref[...] = out.astype(o_ref.dtype)


def _fused_kernel_res(x_ref, w_ref, bias_ref, res_ref, o_ref, acc_ref, *, apply_relu):
    @pl.when(pl.program_id(2) == 0)
    def _():
        acc_ref[...] = jnp.zeros_like(acc_ref)

    acc_ref[...] += jnp.dot(x_ref[...], w_ref[...],
                            preferred_element_type=jnp.float32)

    @pl.when(pl.program_id(2) == pl.num_programs(2) - 1)
    def _():
        out = acc_ref[...] + bias_ref[...] + res_ref[...].astype(jnp.float32)
        if apply_relu:
            out = jnp.maximum(out, 0.0)
        o_ref[...] = out.astype(o_ref.dtype)


def _round_up(x, m):
    return (x + m - 1) // m * m


def fused_conv_matmul(patches, w_mat, bias, residual=None, *,
                      apply_relu, out_dtype=jnp.bfloat16):
    """Tiled fused matmul: (M, K) @ (K, N) + bias [+ residual] [+ ReLU].

    patches: (M, K), w_mat: (K, N) with BN scale already folded in,
    bias: (1, N) f32, residual: optional (M, N).
    Inputs are cast to bf16 for the MXU; accumulation is f32.
    Returns (M, N) in `out_dtype`.
    """
    M, K = patches.shape
    Kw, N = w_mat.shape
    assert K == Kw

    # Tile sizes (multiples of (8, 128); sized so double-buffered tiles stay
    # well under v7x's 64 MiB VMEM even at TM=256, TN=256, TK=512 -> ~2 MiB).
    TM = min(256, _round_up(M, 8))
    TN = min(256, _round_up(N, 128))
    TK = min(512, _round_up(K, 128))
    Mp = _round_up(M, TM)
    Np = _round_up(N, TN)
    Kp = _round_up(K, TK)

    x = jnp.pad(patches, ((0, Mp - M), (0, Kp - K))).astype(jnp.bfloat16)
    w = jnp.pad(w_mat, ((0, Kp - K), (0, Np - N))).astype(jnp.bfloat16)
    b = jnp.pad(bias, ((0, 0), (0, Np - N))).astype(jnp.float32)

    in_specs = [
        pl.BlockSpec((TM, TK), lambda i, j, k: (i, k)),
        pl.BlockSpec((TK, TN), lambda i, j, k: (k, j)),
        pl.BlockSpec((1, TN), lambda i, j, k: (0, j)),
    ]
    args = [x, w, b]

    if residual is not None:
        r = jnp.pad(residual, ((0, Mp - M), (0, Np - N))).astype(jnp.bfloat16)
        in_specs.append(pl.BlockSpec((TM, TN), lambda i, j, k: (i, j)))
        args.append(r)
        kernel = functools.partial(_fused_kernel_res, apply_relu=apply_relu)
    else:
        kernel = functools.partial(_fused_kernel_nores, apply_relu=apply_relu)

    out = pl.pallas_call(
        kernel,
        out_shape=jax.ShapeDtypeStruct((Mp, Np), out_dtype),
        grid_spec=pltpu.PrefetchScalarGridSpec(
            num_scalar_prefetch=0,
            grid=(Mp // TM, Np // TN, Kp // TK),
            in_specs=in_specs,
            out_specs=pl.BlockSpec((TM, TN), lambda i, j, k: (i, j)),
            scratch_shapes=[pltpu.VMEM((TM, TN), jnp.float32)],
        ),
        compiler_params=pltpu.CompilerParams(
            dimension_semantics=("parallel", "parallel", "arbitrary"),
            vmem_limit_bytes=48 * 1024 * 1024,
        ),
    )(*args)
    return out[:M, :N]


# ----------------------------------------------------------------------------
# Glue: im2col, BN folding, parameter init / preparation
# ----------------------------------------------------------------------------
def im2col(x_nhwc, ksize, stride, pad):
    """Extract conv patches. Returns ((N*Ho*Wo, k*k*C), Ho, Wo).
    Flattened K index order is (kh, kw, cin) — matches weight transpose below."""
    N, H, W, C = x_nhwc.shape
    xp = jnp.pad(x_nhwc, ((0, 0), (pad, pad), (pad, pad), (0, 0)))
    Ho = (H + 2 * pad - ksize) // stride + 1
    Wo = (W + 2 * pad - ksize) // stride + 1
    cols = []
    for dh in range(ksize):
        for dw in range(ksize):
            cols.append(xp[:, dh:dh + stride * Ho:stride,
                           dw:dw + stride * Wo:stride, :])
    patches = jnp.concatenate(cols, axis=-1)          # (N, Ho, Wo, k*k*C)
    return patches.reshape(N * Ho * Wo, ksize * ksize * C), Ho, Wo


def weight_oihw_to_mat(w_oihw):
    """PyTorch (Cout, Cin, kh, kw) -> (kh*kw*Cin, Cout) matching im2col K order."""
    cout, cin, kh, kw = w_oihw.shape
    return jnp.transpose(w_oihw, (2, 3, 1, 0)).reshape(kh * kw * cin, cout)


def fold_bn(gamma, beta, mean, var, eps=1e-5):
    scale = gamma / jnp.sqrt(var + eps)
    bias = beta - mean * scale
    return scale.reshape(1, -1), bias.reshape(1, -1)


def prepare_block_params(params):
    """Hoisted out of the hot path: weight-matrix layout + BN scale folded into W."""
    s1, b1 = fold_bn(*params["bn1"])
    s2, b2 = fold_bn(*params["bn2"])
    ss, bs = fold_bn(*params["bns"])
    return {
        "w1": (weight_oihw_to_mat(params["w1"]) * s1).astype(jnp.bfloat16),
        "b1": b1.astype(jnp.float32),
        "w2": (weight_oihw_to_mat(params["w2"]) * s2).astype(jnp.bfloat16),
        "b2": b2.astype(jnp.float32),
        "ws": (weight_oihw_to_mat(params["ws"]) * ss).astype(jnp.bfloat16),
        "bs": bs.astype(jnp.float32),
    }


def init_basic_block_params(key, in_channels, out_channels):
    ks = jax.random.split(key, 12)

    def normal(k, shape, s=0.1):
        return s * jax.random.normal(k, shape, dtype=jnp.float32)

    params = {
        "w1": normal(ks[0], (out_channels, in_channels, 3, 3)),
        "bn1": (1.0 + normal(ks[1], (out_channels,)), normal(ks[2], (out_channels,)),
                normal(ks[3], (out_channels,)),
                0.5 + jnp.abs(normal(ks[4], (out_channels,), 1.0))),
        "w2": normal(ks[5], (out_channels, out_channels, 3, 3)),
        "bn2": (1.0 + normal(ks[6], (out_channels,)), normal(ks[7], (out_channels,)),
                normal(ks[8], (out_channels,)),
                0.5 + jnp.abs(normal(ks[9], (out_channels,), 1.0))),
        "ws": normal(ks[10], (out_channels, in_channels, 1, 1)),
        "bns": (jnp.ones((out_channels,), jnp.float32),
                jnp.zeros((out_channels,), jnp.float32),
                normal(ks[11], (out_channels,)),
                jnp.ones((out_channels,), jnp.float32)),
    }
    return params


# ----------------------------------------------------------------------------
# BasicBlock forward (Pallas hot path)
# ----------------------------------------------------------------------------
def basic_block_forward(x_nchw, prepped, *, stride):
    batch, Cin, H, W = x_nchw.shape
    Cout = prepped["w1"].shape[1]
    x_nhwc = jnp.transpose(x_nchw, (0, 2, 3, 1)).astype(jnp.bfloat16)

    # --- residual branch, conv1 (3x3, stride) + BN1 + ReLU  (no residual input) ---
    p1, Ho, Wo = im2col(x_nhwc, 3, stride, 1)
    h1 = fused_conv_matmul(p1, prepped["w1"], prepped["b1"],
                           residual=None, apply_relu=True,
                           out_dtype=jnp.bfloat16)            # (batch*Ho*Wo, Cout)
    h1_nhwc = h1.reshape(batch, Ho, Wo, Cout)

    # --- shortcut branch: 1x1 conv (stride) + BN, no ReLU, no residual input -------
    ps, _, _ = im2col(x_nhwc, 1, stride, 0)
    shortcut = fused_conv_matmul(ps, prepped["ws"], prepped["bs"],
                                 residual=None, apply_relu=False,
                                 out_dtype=jnp.bfloat16)      # (batch*Ho*Wo, Cout)

    # --- residual branch, conv2 (3x3, s=1) + BN2, fused shortcut-add + ReLU --------
    p2, Ho2, Wo2 = im2col(h1_nhwc, 3, 1, 1)
    out = fused_conv_matmul(p2, prepped["w2"], prepped["b2"],
                            residual=shortcut, apply_relu=True,
                            out_dtype=jnp.float32)            # fused add + ReLU

    out_nhwc = out.reshape(batch, Ho2, Wo2, Cout)
    return jnp.transpose(out_nhwc, (0, 3, 1, 2))              # back to NCHW


# ----------------------------------------------------------------------------
# Pure-JAX reference (f32, for verification)
# ----------------------------------------------------------------------------
def _conv_ref(x_nhwc, w_oihw, stride, pad):
    w_hwio = jnp.transpose(w_oihw, (2, 3, 1, 0))
    return jax.lax.conv_general_dilated(
        x_nhwc, w_hwio, (stride, stride), [(pad, pad), (pad, pad)],
        dimension_numbers=("NHWC", "HWIO", "NHWC"))


def basic_block_reference(x_nchw, params, stride):
    x = jnp.transpose(x_nchw, (0, 2, 3, 1)).astype(jnp.float32)

    def bn(y, bnp):
        g, b, m, v = bnp
        return (y - m) / jnp.sqrt(v + 1e-5) * g + b

    h = jax.nn.relu(bn(_conv_ref(x, params["w1"], stride, 1), params["bn1"]))
    h = bn(_conv_ref(h, params["w2"], 1, 1), params["bn2"])
    sc = bn(_conv_ref(x, params["ws"], stride, 0), params["bns"])
    out = jax.nn.relu(h + sc)
    return jnp.transpose(out, (0, 3, 1, 2))


# ----------------------------------------------------------------------------
if __name__ == "__main__":
    key = jax.random.PRNGKey(0)
    k_x, k_p = jax.random.split(key)

    N, Cin, H, W = 2, 4, 16, 16
    Cout, stride = 8, 2   # stride != 1 and Cin != Cout -> projection shortcut active

    x = jax.random.normal(k_x, (N, Cin, H, W), dtype=jnp.float32)
    params = init_basic_block_params(k_p, Cin, Cout)
    prepped = prepare_block_params(params)   # weight layout + BN folding, done once

    fwd = jax.jit(functools.partial(basic_block_forward, stride=stride))
    out = jax.block_until_ready(fwd(x, prepped))

    ref = jax.block_until_ready(basic_block_reference(x, params, stride))
    assert out.shape == (N, Cout, H // stride, W // stride), out.shape
    max_err = float(jnp.max(jnp.abs(out - ref)))
    # bf16 MXU inputs (f32 accumulation) -> loosened tolerance vs. the f32 reference.
    assert jnp.allclose(out, ref, atol=5e-2, rtol=5e-2), max_err

    print("KERNEL_OK")
</pallas_src>

<mosaic_0001>
module attributes {stable_mosaic.version = 11 : i64} {
  func.func @_fused_kernel_nores(%arg0: i32, %arg1: i32, %arg2: i32, %arg3: memref<128x128xbf16, #tpu.memory_space<vmem>>, %arg4: memref<128x128xbf16, #tpu.memory_space<vmem>>, %arg5: memref<1x128xf32, #tpu.memory_space<vmem>>, %arg6: memref<128x128xbf16, #tpu.memory_space<vmem>>, %arg7: memref<128x128xf32, #tpu.memory_space<vmem>>) attributes {dimension_semantics = [#tpu.dimension_semantics<parallel>, #tpu.dimension_semantics<parallel>, #tpu.dimension_semantics<arbitrary>], iteration_bounds = array<i64: 1, 1, 1>, scalar_prefetch = 0 : i64, scratch_operands = 1 : i64, tpu.core_type = #tpu.core_type<tc>, window_params = [{transform_indices = @transform_0, window_bounds = array<i64: 128, 128>}, {transform_indices = @transform_1, window_bounds = array<i64: 128, 128>}, {transform_indices = @transform_2, window_bounds = array<i64: 1, 128>}, {transform_indices = @transform_3, window_bounds = array<i64: 128, 128>}]} {
    %c0_i32 = arith.constant 0 : i32
    %0 = arith.cmpi eq, %arg2, %c0_i32 : i32
    %1 = arith.extui %0 : i1 to i32
    %c0_i32_0 = arith.constant 0 : i32
    %2 = arith.cmpi ne, %1, %c0_i32_0 : i32
    scf.if %2 {
      %cst_10 = arith.constant 0.000000e+00 : f32
      %12 = vector.broadcast %cst_10 : f32 to vector<128x128xf32>
      %c0_11 = arith.constant 0 : index
      %c0_12 = arith.constant 0 : index
      %13 = vector.load %arg7[%c0_11, %c0_12] : memref<128x128xf32, #tpu.memory_space<vmem>>, vector<128x128xf32>
      tpu.vector_store %arg7[%c0_11, %c0_12], %12 {strides = array<i32>} : memref<128x128xf32, #tpu.memory_space<vmem>>, vector<128x128xf32>,
    } else {
    }
    %c0 = arith.constant 0 : index
    %c0_1 = arith.constant 0 : index
    %3 = vector.load %arg7[%c0, %c0_1] : memref<128x128xf32, #tpu.memory_space<vmem>>, vector<128x128xf32>
    %c0_2 = arith.constant 0 : index
    %c0_3 = arith.constant 0 : index
    %4 = vector.load %arg3[%c0_2, %c0_3] : memref<128x128xbf16, #tpu.memory_space<vmem>>, vector<128x128xbf16>
    %c0_4 = arith.constant 0 : index
    %c0_5 = arith.constant 0 : index
    %5 = vector.load %arg4[%c0_4, %c0_5] : memref<128x128xbf16, #tpu.memory_space<vmem>>, vector<128x128xbf16>
    %cst = arith.constant dense<0.000000e+00> : vector<128x128xf32>
    %6 = tpu.matmul %4, %5, %cst {dimension_numbers = #tpu.dot_dimension_numbers<[1], [0], [0], [1], [0, 0, 1, 1], [], []>} : vector<128x128xbf16>, vector<128x128xbf16>, vector<128x128xf32> -> vector<128x128xf32>
    %7 = arith.addf %3, %6 : vector<128x128xf32>
    %c0_6 = arith.constant 0 : index
    %c0_7 = arith.constant 0 : index
    %8 = vector.load %arg7[%c0_6, %c0_7] : memref<128x128xf32, #tpu.memory_space<vmem>>, vector<128x128xf32>
    tpu.vector_store %arg7[%c0_6, %c0_7], %7 {strides = array<i32>} : memref<128x128xf32, #tpu.memory_space<vmem>>, vector<128x128xf32>,
    %c0_i32_8 = arith.constant 0 : i32
    %9 = arith.cmpi eq, %arg2, %c0_i32_8 : i32
    %10 = arith.extui %9 : i1 to i32
    %c0_i32_9 = arith.constant 0 : i32
    %11 = arith.cmpi ne, %10, %c0_i32_9 : i32
    scf.if %11 {
      %c0_10 = arith.constant 0 : index
      %c0_11 = arith.constant 0 : index
      %12 = vector.load %arg7[%c0_10, %c0_11] : memref<128x128xf32, #tpu.memory_space<vmem>>, vector<128x128xf32>
      %c0_12 = arith.constant 0 : index
      %c0_13 = arith.constant 0 : index
      %13 = vector.load %arg5[%c0_12, %c0_13] : memref<1x128xf32, #tpu.memory_space<vmem>>, vector<1x128xf32>
      %14 = vector.broadcast %13 : vector<1x128xf32> to vector<128x128xf32>
      %15 = arith.addf %12, %14 : vector<128x128xf32>
      %cst_14 = arith.constant 0.000000e+00 : f32
      %16 = vector.broadcast %cst_14 : f32 to vector<128x128xf32>
      %17 = arith.maximumf %15, %16 : vector<128x128xf32>
      %18 = arith.truncf %17 : vector<128x128xf32> to vector<128x128xbf16>
      %c0_15 = arith.constant 0 : index
      %c0_16 = arith.constant 0 : index
      %19 = vector.load %arg6[%c0_15, %c0_16] : memref<128x128xbf16, #tpu.memory_space<vmem>>, vector<128x128xbf16>
      tpu.vector_store %arg6[%c0_15, %c0_16], %18 {strides = array<i32>} : memref<128x128xbf16, #tpu.memory_space<vmem>>, vector<128x128xbf16>,
    } else {
    }
    return
  }
  func.func @transform_0(%arg0: i32, %arg1: i32, %arg2: i32) -> (i32, i32) {
    %c0_i32 = arith.constant 0 : i32
    return %arg0, %arg2 : i32, i32
  }
  func.func @transform_1(%arg0: i32, %arg1: i32, %arg2: i32) -> (i32, i32) {
    %c0_i32 = arith.constant 0 : i32
    return %arg2, %arg1 : i32, i32
  }
  func.func @transform_2(%arg0: i32, %arg1: i32, %arg2: i32) -> (i32, i32) {
    %c0_i32 = arith.constant 0 : i32
    %c0_i32_0 = arith.constant 0 : i32
    return %c0_i32, %arg1 : i32, i32
  }
  func.func @transform_3(%arg0: i32, %arg1: i32, %arg2: i32) -> (i32, i32) {
    %c0_i32 = arith.constant 0 : i32
    return %arg0, %arg1 : i32, i32
  }
}

module attributes {stable_mosaic.version = 11 : i64} {
  func.func @_fused_kernel_nores(%arg0: i32, %arg1: i32, %arg2: i32, %arg3: memref<128x128xbf16, #tpu.memory_space<vmem>>, %arg4: memref<128x128xbf16, #tpu.memory_space<vmem>>, %arg5: memref<1x128xf32, #tpu.memory_space<vmem>>, %arg6: memref<128x128xbf16, #tpu.memory_space<vmem>>, %arg7: memref<128x128xf32, #tpu.memory_space<vmem>>) attributes {dimension_semantics = [#tpu.dimension_semantics<parallel>, #tpu.dimension_semantics<parallel>, #tpu.dimension_semantics<arbitrary>], iteration_bounds = array<i64: 1, 1, 1>, scalar_prefetch = 0 : i64, scratch_operands = 1 : i64, tpu.core_type = #tpu.core_type<tc>, window_params = [{transform_indices = @transform_0, window_bounds = array<i64: 128, 128>}, {transform_indices = @transform_1, window_bounds = array<i64: 128, 128>}, {transform_indices = @transform_2, window_bounds = array<i64: 1, 128>}, {transform_indices = @transform_3, window_bounds = array<i64: 128, 128>}]} {
    %c0_i32 = arith.constant 0 : i32
    %0 = arith.cmpi eq, %arg2, %c0_i32 : i32
    %1 = arith.extui %0 : i1 to i32
    %c0_i32_0 = arith.constant 0 : i32
    %2 = arith.cmpi ne, %1, %c0_i32_0 : i32
    scf.if %2 {
      %cst_10 = arith.constant 0.000000e+00 : f32
      %12 = vector.broadcast %cst_10 : f32 to vector<128x128xf32>
      %c0_11 = arith.constant 0 : index
      %c0_12 = arith.constant 0 : index
      %13 = vector.load %arg7[%c0_11, %c0_12] : memref<128x128xf32, #tpu.memory_space<vmem>>, vector<128x128xf32>
      tpu.vector_store %arg7[%c0_11, %c0_12], %12 {strides = array<i32>} : memref<128x128xf32, #tpu.memory_space<vmem>>, vector<128x128xf32>,
    } else {
    }
    %c0 = arith.constant 0 : index
    %c0_1 = arith.constant 0 : index
    %3 = vector.load %arg7[%c0, %c0_1] : memref<128x128xf32, #tpu.memory_space<vmem>>, vector<128x128xf32>
    %c0_2 = arith.constant 0 : index
    %c0_3 = arith.constant 0 : index
    %4 = vector.load %arg3[%c0_2, %c0_3] : memref<128x128xbf16, #tpu.memory_space<vmem>>, vector<128x128xbf16>
    %c0_4 = arith.constant 0 : index
    %c0_5 = arith.constant 0 : index
    %5 = vector.load %arg4[%c0_4, %c0_5] : memref<128x128xbf16, #tpu.memory_space<vmem>>, vector<128x128xbf16>
    %cst = arith.constant dense<0.000000e+00> : vector<128x128xf32>
    %6 = tpu.matmul %4, %5, %cst {dimension_numbers = #tpu.dot_dimension_numbers<[1], [0], [0], [1], [0, 0, 1, 1], [], []>} : vector<128x128xbf16>, vector<128x128xbf16>, vector<128x128xf32> -> vector<128x128xf32>
    %7 = arith.addf %3, %6 : vector<128x128xf32>
    %c0_6 = arith.constant 0 : index
    %c0_7 = arith.constant 0 : index
    %8 = vector.load %arg7[%c0_6, %c0_7] : memref<128x128xf32, #tpu.memory_space<vmem>>, vector<128x128xf32>
    tpu.vector_store %arg7[%c0_6, %c0_7], %7 {strides = array<i32>} : memref<128x128xf32, #tpu.memory_space<vmem>>, vector<128x128xf32>,
    %c0_i32_8 = arith.constant 0 : i32
    %9 = arith.cmpi eq, %arg2, %c0_i32_8 : i32
    %10 = arith.extui %9 : i1 to i32
    %c0_i32_9 = arith.constant 0 : i32
    %11 = arith.cmpi ne, %10, %c0_i32_9 : i32
    scf.if %11 {
      %c0_10 = arith.constant 0 : index
      %c0_11 = arith.constant 0 : index
      %12 = vector.load %arg7[%c0_10, %c0_11] : memref<128x128xf32, #tpu.memory_space<vmem>>, vector<128x128xf32>
      %c0_12 = arith.constant 0 : index
      %c0_13 = arith.constant 0 : index
      %13 = vector.load %arg5[%c0_12, %c0_13] : memref<1x128xf32, #tpu.memory_space<vmem>>, vector<1x128xf32>
      %14 = vector.broadcast %13 : vector<1x128xf32> to vector<128x128xf32>
      %15 = arith.addf %12, %14 : vector<128x128xf32>
      %16 = arith.truncf %15 : vector<128x128xf32> to vector<128x128xbf16>
      %c0_14 = arith.constant 0 : index
      %c0_15 = arith.constant 0 : index
      %17 = vector.load %arg6[%c0_14, %c0_15] : memref<128x128xbf16, #tpu.memory_space<vmem>>, vector<128x128xbf16>
      tpu.vector_store %arg6[%c0_14, %c0_15], %16 {strides = array<i32>} : memref<128x128xbf16, #tpu.memory_space<vmem>>, vector<128x128xbf16>,
    } else {
    }
    return
  }
  func.func @transform_0(%arg0: i32, %arg1: i32, %arg2: i32) -> (i32, i32) {
    %c0_i32 = arith.constant 0 : i32
    return %arg0, %arg2 : i32, i32
  }
  func.func @transform_1(%arg0: i32, %arg1: i32, %arg2: i32) -> (i32, i32) {
    %c0_i32 = arith.constant 0 : i32
    return %arg2, %arg1 : i32, i32
  }
  func.func @transform_2(%arg0: i32, %arg1: i32, %arg2: i32) -> (i32, i32) {
    %c0_i32 = arith.constant 0 : i32
    %c0_i32_0 = arith.constant 0 : i32
    return %c0_i32, %arg1 : i32, i32
  }
  func.func @transform_3(%arg0: i32, %arg1: i32, %arg2: i32) -> (i32, i32) {
    %c0_i32 = arith.constant 0 : i32
    return %arg0, %arg1 : i32, i32
  }
}

module attributes {stable_mosaic.version = 11 : i64} {
  func.func @_fused_kernel_res(%arg0: i32, %arg1: i32, %arg2: i32, %arg3: memref<128x128xbf16, #tpu.memory_space<vmem>>, %arg4: memref<128x128xbf16, #tpu.memory_space<vmem>>, %arg5: memref<1x128xf32, #tpu.memory_space<vmem>>, %arg6: memref<128x128xbf16, #tpu.memory_space<vmem>>, %arg7: memref<128x128xf32, #tpu.memory_space<vmem>>, %arg8: memref<128x128xf32, #tpu.memory_space<vmem>>) attributes {dimension_semantics = [#tpu.dimension_semantics<parallel>, #tpu.dimension_semantics<parallel>, #tpu.dimension_semantics<arbitrary>], iteration_bounds = array<i64: 1, 1, 1>, scalar_prefetch = 0 : i64, scratch_operands = 1 : i64, tpu.core_type = #tpu.core_type<tc>, window_params = [{transform_indices = @transform_0, window_bounds = array<i64: 128, 128>}, {transform_indices = @transform_1, window_bounds = array<i64: 128, 128>}, {transform_indices = @transform_2, window_bounds = array<i64: 1, 128>}, {transform_indices = @transform_3, window_bounds = array<i64: 128, 128>}, {transform_indices = @transform_4, window_bounds = array<i64: 128, 128>}]} {
    %c0_i32 = arith.constant 0 : i32
    %0 = arith.cmpi eq, %arg2, %c0_i32 : i32
    %1 = arith.extui %0 : i1 to i32
    %c0_i32_0 = arith.constant 0 : i32
    %2 = arith.cmpi ne, %1, %c0_i32_0 : i32
    scf.if %2 {
      %cst_10 = arith.constant 0.000000e+00 : f32
      %12 = vector.broadcast %cst_10 : f32 to vector<128x128xf32>
      %c0_11 = arith.constant 0 : index
      %c0_12 = arith.constant 0 : index
      %13 = vector.load %arg8[%c0_11, %c0_12] : memref<128x128xf32, #tpu.memory_space<vmem>>, vector<128x128xf32>
      tpu.vector_store %arg8[%c0_11, %c0_12], %12 {strides = array<i32>} : memref<128x128xf32, #tpu.memory_space<vmem>>, vector<128x128xf32>,
    } else {
    }
    %c0 = arith.constant 0 : index
    %c0_1 = arith.constant 0 : index
    %3 = vector.load %arg8[%c0, %c0_1] : memref<128x128xf32, #tpu.memory_space<vmem>>, vector<128x128xf32>
    %c0_2 = arith.constant 0 : index
    %c0_3 = arith.constant 0 : index
    %4 = vector.load %arg3[%c0_2, %c0_3] : memref<128x128xbf16, #tpu.memory_space<vmem>>, vector<128x128xbf16>
    %c0_4 = arith.constant 0 : index
    %c0_5 = arith.constant 0 : index
    %5 = vector.load %arg4[%c0_4, %c0_5] : memref<128x128xbf16, #tpu.memory_space<vmem>>, vector<128x128xbf16>
    %cst = arith.constant dense<0.000000e+00> : vector<128x128xf32>
    %6 = tpu.matmul %4, %5, %cst {dimension_numbers = #tpu.dot_dimension_numbers<[1], [0], [0], [1], [0, 0, 1, 1], [], []>} : vector<128x128xbf16>, vector<128x128xbf16>, vector<128x128xf32> -> vector<128x128xf32>
    %7 = arith.addf %3, %6 : vector<128x128xf32>
    %c0_6 = arith.constant 0 : index
    %c0_7 = arith.constant 0 : index
    %8 = vector.load %arg8[%c0_6, %c0_7] : memref<128x128xf32, #tpu.memory_space<vmem>>, vector<128x128xf32>
    tpu.vector_store %arg8[%c0_6, %c0_7], %7 {strides = array<i32>} : memref<128x128xf32, #tpu.memory_space<vmem>>, vector<128x128xf32>,
    %c0_i32_8 = arith.constant 0 : i32
    %9 = arith.cmpi eq, %arg2, %c0_i32_8 : i32
    %10 = arith.extui %9 : i1 to i32
    %c0_i32_9 = arith.constant 0 : i32
    %11 = arith.cmpi ne, %10, %c0_i32_9 : i32
    scf.if %11 {
      %c0_10 = arith.constant 0 : index
      %c0_11 = arith.constant 0 : index
      %12 = vector.load %arg8[%c0_10, %c0_11] : memref<128x128xf32, #tpu.memory_space<vmem>>, vector<128x128xf32>
      %c0_12 = arith.constant 0 : index
      %c0_13 = arith.constant 0 : index
      %13 = vector.load %arg5[%c0_12, %c0_13] : memref<1x128xf32, #tpu.memory_space<vmem>>, vector<1x128xf32>
      %14 = vector.broadcast %13 : vector<1x128xf32> to vector<128x128xf32>
      %15 = arith.addf %12, %14 : vector<128x128xf32>
      %c0_14 = arith.constant 0 : index
      %c0_15 = arith.constant 0 : index
      %16 = vector.load %arg6[%c0_14, %c0_15] : memref<128x128xbf16, #tpu.memory_space<vmem>>, vector<128x128xbf16>
      %17 = arith.extf %16 : vector<128x128xbf16> to vector<128x128xf32>
      %18 = arith.addf %15, %17 : vector<128x128xf32>
      %cst_16 = arith.constant 0.000000e+00 : f32
      %19 = vector.broadcast %cst_16 : f32 to vector<128x128xf32>
      %20 = arith.maximumf %18, %19 : vector<128x128xf32>
      %c0_17 = arith.constant 0 : index
      %c0_18 = arith.constant 0 : index
      %21 = vector.load %arg7[%c0_17, %c0_18] : memref<128x128xf32, #tpu.memory_space<vmem>>, vector<128x128xf32>
      tpu.vector_store %arg7[%c0_17, %c0_18], %20 {strides = array<i32>} : memref<128x128xf32, #tpu.memory_space<vmem>>, vector<128x128xf32>,
    } else {
    }
    return
  }
  func.func @transform_0(%arg0: i32, %arg1: i32, %arg2: i32) -> (i32, i32) {
    %c0_i32 = arith.constant 0 : i32
    return %arg0, %arg2 : i32, i32
  }
  func.func @transform_1(%arg0: i32, %arg1: i32, %arg2: i32) -> (i32, i32) {
    %c0_i32 = arith.constant 0 : i32
    return %arg2, %arg1 : i32, i32
  }
  func.func @transform_2(%arg0: i32, %arg1: i32, %arg2: i32) -> (i32, i32) {
    %c0_i32 = arith.constant 0 : i32
    %c0_i32_0 = arith.constant 0 : i32
    return %c0_i32, %arg1 : i32, i32
  }
  func.func @transform_3(%arg0: i32, %arg1: i32, %arg2: i32) -> (i32, i32) {
    %c0_i32 = arith.constant 0 : i32
    return %arg0, %arg1 : i32, i32
  }
  func.func @transform_4(%arg0: i32, %arg1: i32, %arg2: i32) -> (i32, i32) {
    %c0_i32 = arith.constant 0 : i32
    return %arg0, %arg1 : i32, i32
  }
}

</mosaic_0001>

<bundles_post_ra>
// kernel: basic_block_forward.3
= control target key start
LH: loop header
LB: loop body
LE: loop exit
PB: predicated region body
PF: predicated region fallthrough
CT: control target
= control target key end

     0   :  { %s721_s1 = inlined_call_operand.vmem [shape: bf16[128,128], index: 1, kind: input, shape index: {}]   ;;  %s722_s0 = inlined_call_operand.vmem [shape: bf16[128,128], index: 0, kind: input, shape index: {}]   ;;  %s723_s2 = inlined_call_operand.vmem [shape: f32[1,128], index: 2, kind: input, shape index: {}]   ;;  %s724_s3 = inlined_call_operand.vmem [shape: bf16[128,128], index: 3, kind: output, shape index: {}]  }
   0x1   :  { %v610_v0 = vld [vmem:[%s721_s1] sm:$0xff]   ;;  %v611_v1 = vld [vmem:[%s721_s1 + $0x8] sm:$0xff]   ;;  %v612_v2 = vld [vmem:[%s721_s1 + $0x10] sm:$0xff]  }
   0x2   :  { %562 = vmatprep.subr.bf16.mxu0 %v610_v0  ;;  %594 = vmatprep.subr.bf16.mxu1 %v610_v0  ;;  %v613_v3 = vld [vmem:[%s721_s1 + $0x18] sm:$0xff]   ;;  %v618_v4 = vld [vmem:[%s722_s0] sm:$0xff]   ;;  %v615_v7 = vld [vmem:[%s721_s1 + $0x28] sm:$0xff]  }
   0x3   :  { %563 = vmatpush3.bf16.msra.mxu0 %v610_v0  ;;  %602 = vmatpush3.bf16.msra.mxu1 %v610_v0  ;;  %v619_v5 = vld [vmem:[%s722_s0 + $0x20] sm:$0xff]   ;;  %v616_v8 = vld [vmem:[%s721_s1 + $0x30] sm:$0xff]   ;;  %v617_v9 = vld [vmem:[%s721_s1 + $0x38] sm:$0xff]  }
   0x4   :  { %564 = vmatprep.subr.bf16.mxu0 %v611_v1  ;;  %595 = vmatprep.subr.bf16.mxu1 %v611_v1  ;;  %v614_v6 = vld [vmem:[%s721_s1 + $0x20] sm:$0xff]   ;;  %v620_v10 = vld [vmem:[%s722_s0 + $0x8] sm:$0xff]   ;;  %v622_v12 = vld [vmem:[%s722_s0 + $0x10] sm:$0xff]  }
   0x5   :  { %578 = vmatprep.mubr.bf16.mxu0 %v618_v4  ;;  %586 = vmatprep.mubr.bf16.mxu1 %v619_v5  ;;  %v621_v11 = vld [vmem:[%s722_s0 + $0x28] sm:$0xff]   ;;  %v623_v13 = vld [vmem:[%s722_s0 + $0x30] sm:$0xff]   ;;  %v624_v14 = vld [vmem:[%s722_s0 + $0x18] sm:$0xff]  }
   0x6   :  { %v625_v15 = vld [vmem:[%s722_s0 + $0x38] sm:$0xff]   ;;  %v466_v16 = vld [vmem:[%s723_s2] ss:$0 sm:$0xff] }
   0x7   :  { %565 = vmatpush3.bf16.msra.mxu0 %v611_v1  ;;  %603 = vmatpush3.bf16.msra.mxu1 %v611_v1 }
   0x8   :  { %566 = vmatprep.subr.bf16.mxu0 %v612_v2  ;;  %596 = vmatprep.subr.bf16.mxu1 %v612_v2 }
   0xb   :  { %567 = vmatpush3.bf16.msra.mxu0 %v612_v2  ;;  %604 = vmatpush3.bf16.msra.mxu1 %v612_v2 }
   0xc   :  { %568 = vmatprep.subr.bf16.mxu0 %v613_v3  ;;  %597 = vmatprep.subr.bf16.mxu1 %v613_v3 }
   0xf   :  { %569 = vmatpush3.bf16.msra.mxu0 %v613_v3  ;;  %605 = vmatpush3.bf16.msra.mxu1 %v613_v3 }
  0x10   :  { %570 = vmatprep.subr.bf16.mxu0 %v614_v6  ;;  %598 = vmatprep.subr.bf16.mxu1 %v614_v6 }
  0x13   :  { %571 = vmatpush3.bf16.msra.mxu0 %v614_v6  ;;  %606 = vmatpush3.bf16.msra.mxu1 %v614_v6 }
  0x14   :  { %572 = vmatprep.subr.bf16.mxu0 %v615_v7  ;;  %599 = vmatprep.subr.bf16.mxu1 %v615_v7 }
  0x17   :  { %573 = vmatpush3.bf16.msra.mxu0 %v615_v7  ;;  %607 = vmatpush3.bf16.msra.mxu1 %v615_v7 }
  0x18   :  { %574 = vmatprep.subr.bf16.mxu0 %v616_v8  ;;  %600 = vmatprep.subr.bf16.mxu1 %v616_v8 }
  0x1b   :  { %575 = vmatpush3.bf16.msra.mxu0 %v616_v8  ;;  %608 = vmatpush3.bf16.msra.mxu1 %v616_v8 }
  0x1c   :  { %576 = vmatprep.subr.bf16.mxu0 %v617_v9  ;;  %601 = vmatprep.subr.bf16.mxu1 %v617_v9 }
  0x1f   :  { %577 = vmatpush3.bf16.msra.mxu0 %v617_v9  ;;  %609 = vmatpush3.bf16.msra.mxu1 %v617_v9 }
  0x22   :  { %579 = vmatmul.mubr.bf16.vlgmr.msra.gmra.mrb[0].mxu0 %v620_v10  ;;  %587 = vmatmul.mubr.bf16.vlgmr.msra.gmra.mrb[0].mxu1 %v621_v11 }
  0x23   :  { %582 = vmatprep.mubr.bf16.mxu0 %v622_v12  ;;  %590 = vmatprep.mubr.bf16.mxu1 %v623_v13 }
  0x2a   :  { %583 = vmatmul.mubr.bf16.gmra.mrb[4].mxu0 %v624_v14  ;;  %591 = vmatmul.mubr.bf16.gmra.mrb[4].mxu1 %v625_v15 }
  0xf5   :  { %v580_v17 = vpop.f32.mrb[0].mxu0  ;;  %v588_v18 = vpop.f32.mrb[0].mxu1 }
  0xf6   :  { %v336_v19 = vadd.f32 %v580_v17, %v466_v16  ;;  %v344_v20 = vadd.f32 %v588_v18, %v466_v16  ;;  %v213_v21 = vpop.f32.mrb[1].mxu0  ;;  %v245_v22 = vpop.f32.mrb[1].mxu1 }
  0xf7   :  { %v334_v23 = vadd.f32 %v466_v16, %v213_v21  ;;  %v342_v24 = vadd.f32 %v466_v16, %v245_v22  ;;  %v581_v25 = vpop.f32.mrb[2].mxu0  ;;  %v589_v26 = vpop.f32.mrb[2].mxu1 }
  0xf8   :  { %v337_v27 = vadd.f32 %v581_v25, %v466_v16  ;;  %v345_v28 = vadd.f32 %v589_v26, %v466_v16  ;;  %v216_v29 = vpop.f32.mrb[3].mxu0  ;;  %v248_v30 = vpop.f32.mrb[3].mxu1  ;;  %v352_v33 = vmax.f32 %v336_v19, 0.0  ;;  %v360_v34 = vmax.f32 %v344_v20, 0.0 }
  0xf9   :  { %v335_v31 = vadd.f32 %v466_v16, %v216_v29  ;;  %v343_v32 = vadd.f32 %v466_v16, %v248_v30  ;;  %v350_v37 = vmax.f32 %v334_v23, 0.0  ;;  %v358_v38 = vmax.f32 %v342_v24, 0.0 }
  0xfa   :  { %v353_v35 = vmax.f32 %v337_v27, 0.0  ;;  %v361_v36 = vmax.f32 %v345_v28, 0.0 }
  0xfb   :  { %v351_v39 = vmax.f32 %v335_v31, 0.0  ;;  %v359_v40 = vmax.f32 %v343_v32, 0.0 }
  0xfc   :  { %v507_v41 = vpack.c.bf16 %v353_v35, %v352_v33  ;;  %v527_v42 = vpack.c.bf16 %v361_v36, %v360_v34 }
  0xfd   :  { %v502_v43 = vpack.c.bf16 %v351_v39, %v350_v37  ;;  %v522_v44 = vpack.c.bf16 %v359_v40, %v358_v38  ;;  %v584_v45 = vpop.f32.mrb[4].mxu0  ;;  %v592_v46 = vpop.f32.mrb[4].mxu1 }
  0xfe   :  { %539 = vst [vmem:[%s724_s3 + $0x8] sm:$0xff] %v507_v41   ;;  %543 = vst [vmem:[%s724_s3 + $0x28] sm:$0xff] %v527_v42   ;;  %v340_v47 = vadd.f32 %v584_v45, %v466_v16  ;;  %v348_v48 = vadd.f32 %v592_v46, %v466_v16  ;;  %v229_v49 = vpop.f32.mrb[5].mxu0  ;;  %v261_v50 = vpop.f32.mrb[5].mxu1 }
  0xff   :  { %503 = vst [vmem:[%s724_s3] sm:$0xff] %v502_v43   ;;  %542 = vst [vmem:[%s724_s3 + $0x20] sm:$0xff] %v522_v44   ;;  %v338_v51 = vadd.f32 %v466_v16, %v229_v49  ;;  %v346_v52 = vadd.f32 %v466_v16, %v261_v50  ;;  %v585_v53 = vpop.f32.mrb[6].mxu0  ;;  %v593_v54 = vpop.f32.mrb[6].mxu1 }
 0x100   :  { %v341_v55 = vadd.f32 %v585_v53, %v466_v16  ;;  %v349_v56 = vadd.f32 %v593_v54, %v466_v16  ;;  %v232_v57 = vpop.f32.mrb[7].mxu0  ;;  %v264_v58 = vpop.f32.mrb[7].mxu1  ;;  %v356_v61 = vmax.f32 %v340_v47, 0.0  ;;  %v364_v62 = vmax.f32 %v348_v48, 0.0 }
 0x101   :  { %v339_v59 = vadd.f32 %v466_v16, %v232_v57  ;;  %v347_v60 = vadd.f32 %v466_v16, %v264_v58  ;;  %v354_v1 = vmax.f32 %v338_v51, 0.0  ;;  %v362_v2 = vmax.f32 %v346_v52, 0.0 }
 0x102   :  { %v357_v63 = vmax.f32 %v341_v55, 0.0  ;;  %v365_v0 = vmax.f32 %v349_v56, 0.0 }
 0x103   :  { %v355_v3 = vmax.f32 %v339_v59, 0.0  ;;  %v363_v4 = vmax.f32 %v347_v60, 0.0 }
 0x104   :  { %v517_v5 = vpack.c.bf16 %v357_v63, %v356_v61  ;;  %v537_v6 = vpack.c.bf16 %v365_v0, %v364_v62 }
 0x105   :  { %v512_v7 = vpack.c.bf16 %v355_v3, %v354_v1  ;;  %v532_v8 = vpack.c.bf16 %v363_v4, %v362_v2 }
 0x106   :  { %541 = vst [vmem:[%s724_s3 + $0x18] sm:$0xff] %v517_v5   ;;  %545 = vst [vmem:[%s724_s3 + $0x38] sm:$0xff] %v537_v6  }
 0x107   :  { %540 = vst [vmem:[%s724_s3 + $0x10] sm:$0xff] %v512_v7   ;;  %544 = vst [vmem:[%s724_s3 + $0x30] sm:$0xff] %v532_v8  }

// kernel: basic_block_forward.4
= control target key start
LH: loop header
LB: loop body
LE: loop exit
PB: predicated region body
PF: predicated region fallthrough
CT: control target
= control target key end

     0   :  { %s705_s1 = inlined_call_operand.vmem [shape: bf16[128,128], index: 1, kind: input, shape index: {}]   ;;  %s706_s0 = inlined_call_operand.vmem [shape: bf16[128,128], index: 0, kind: input, shape index: {}]   ;;  %s707_s2 = inlined_call_operand.vmem [shape: f32[1,128], index: 2, kind: input, shape index: {}]   ;;  %s708_s3 = inlined_call_operand.vmem [shape: bf16[128,128], index: 3, kind: output, shape index: {}]  }
   0x1   :  { %v594_v0 = vld [vmem:[%s705_s1] sm:$0xff]   ;;  %v595_v1 = vld [vmem:[%s705_s1 + $0x8] sm:$0xff]   ;;  %v596_v2 = vld [vmem:[%s705_s1 + $0x10] sm:$0xff]  }
   0x2   :  { %546 = vmatprep.subr.bf16.mxu0 %v594_v0  ;;  %578 = vmatprep.subr.bf16.mxu1 %v594_v0  ;;  %v597_v3 = vld [vmem:[%s705_s1 + $0x18] sm:$0xff]   ;;  %v602_v4 = vld [vmem:[%s706_s0] sm:$0xff]   ;;  %v599_v7 = vld [vmem:[%s705_s1 + $0x28] sm:$0xff]  }
   0x3   :  { %547 = vmatpush3.bf16.msra.mxu0 %v594_v0  ;;  %586 = vmatpush3.bf16.msra.mxu1 %v594_v0  ;;  %v603_v5 = vld [vmem:[%s706_s0 + $0x20] sm:$0xff]   ;;  %v600_v8 = vld [vmem:[%s705_s1 + $0x30] sm:$0xff]   ;;  %v601_v9 = vld [vmem:[%s705_s1 + $0x38] sm:$0xff]  }
   0x4   :  { %548 = vmatprep.subr.bf16.mxu0 %v595_v1  ;;  %579 = vmatprep.subr.bf16.mxu1 %v595_v1  ;;  %v598_v6 = vld [vmem:[%s705_s1 + $0x20] sm:$0xff]   ;;  %v604_v10 = vld [vmem:[%s706_s0 + $0x8] sm:$0xff]   ;;  %v606_v12 = vld [vmem:[%s706_s0 + $0x10] sm:$0xff]  }
   0x5   :  { %562 = vmatprep.mubr.bf16.mxu0 %v602_v4  ;;  %570 = vmatprep.mubr.bf16.mxu1 %v603_v5  ;;  %v605_v11 = vld [vmem:[%s706_s0 + $0x28] sm:$0xff]   ;;  %v607_v13 = vld [vmem:[%s706_s0 + $0x30] sm:$0xff]   ;;  %v608_v14 = vld [vmem:[%s706_s0 + $0x18] sm:$0xff]  }
   0x6   :  { %v609_v15 = vld [vmem:[%s706_s0 + $0x38] sm:$0xff]   ;;  %v450_v17 = vld [vmem:[%s707_s2] ss:$0 sm:$0xff] }
   0x7   :  { %549 = vmatpush3.bf16.msra.mxu0 %v595_v1  ;;  %587 = vmatpush3.bf16.msra.mxu1 %v595_v1 }
   0x8   :  { %550 = vmatprep.subr.bf16.mxu0 %v596_v2  ;;  %580 = vmatprep.subr.bf16.mxu1 %v596_v2 }
   0xb   :  { %551 = vmatpush3.bf16.msra.mxu0 %v596_v2  ;;  %588 = vmatpush3.bf16.msra.mxu1 %v596_v2 }
   0xc   :  { %552 = vmatprep.subr.bf16.mxu0 %v597_v3  ;;  %581 = vmatprep.subr.bf16.mxu1 %v597_v3 }
   0xf   :  { %553 = vmatpush3.bf16.msra.mxu0 %v597_v3  ;;  %589 = vmatpush3.bf16.msra.mxu1 %v597_v3 }
  0x10   :  { %554 = vmatprep.subr.bf16.mxu0 %v598_v6  ;;  %582 = vmatprep.subr.bf16.mxu1 %v598_v6 }
  0x13   :  { %555 = vmatpush3.bf16.msra.mxu0 %v598_v6  ;;  %590 = vmatpush3.bf16.msra.mxu1 %v598_v6 }
  0x14   :  { %556 = vmatprep.subr.bf16.mxu0 %v599_v7  ;;  %583 = vmatprep.subr.bf16.mxu1 %v599_v7 }
  0x17   :  { %557 = vmatpush3.bf16.msra.mxu0 %v599_v7  ;;  %591 = vmatpush3.bf16.msra.mxu1 %v599_v7 }
  0x18   :  { %558 = vmatprep.subr.bf16.mxu0 %v600_v8  ;;  %584 = vmatprep.subr.bf16.mxu1 %v600_v8 }
  0x1b   :  { %559 = vmatpush3.bf16.msra.mxu0 %v600_v8  ;;  %592 = vmatpush3.bf16.msra.mxu1 %v600_v8 }
  0x1c   :  { %560 = vmatprep.subr.bf16.mxu0 %v601_v9  ;;  %585 = vmatprep.subr.bf16.mxu1 %v601_v9 }
  0x1f   :  { %561 = vmatpush3.bf16.msra.mxu0 %v601_v9  ;;  %593 = vmatpush3.bf16.msra.mxu1 %v601_v9 }
  0x22   :  { %563 = vmatmul.mubr.bf16.vlgmr.msra.gmra.mrb[0].mxu0 %v604_v10  ;;  %571 = vmatmul.mubr.bf16.vlgmr.msra.gmra.mrb[0].mxu1 %v605_v11 }
  0x23   :  { %566 = vmatprep.mubr.bf16.mxu0 %v606_v12  ;;  %574 = vmatprep.mubr.bf16.mxu1 %v607_v13 }
  0x2a   :  { %567 = vmatmul.mubr.bf16.gmra.mrb[4].mxu0 %v608_v14  ;;  %575 = vmatmul.mubr.bf16.gmra.mrb[4].mxu1 %v609_v15 }
  0xf5   :  { %v564_v16 = vpop.f32.mrb[0].mxu0  ;;  %v572_v18 = vpop.f32.mrb[0].mxu1 }
  0xf6   :  { %v213_v19 = vpop.f32.mrb[1].mxu0  ;;  %v245_v20 = vpop.f32.mrb[1].mxu1  ;;  %v336_v23 = vadd.f32 %v564_v16, %v450_v17  ;;  %v344_v24 = vadd.f32 %v572_v18, %v450_v17 }
  0xf7   :  { %v565_v21 = vpop.f32.mrb[2].mxu0  ;;  %v573_v22 = vpop.f32.mrb[2].mxu1  ;;  %v334_v29 = vadd.f32 %v450_v17, %v213_v19  ;;  %v342_v30 = vadd.f32 %v450_v17, %v245_v20 }
  0xf8   :  { %v337_v25 = vadd.f32 %v565_v21, %v450_v17  ;;  %v345_v26 = vadd.f32 %v573_v22, %v450_v17  ;;  %v216_v27 = vpop.f32.mrb[3].mxu0  ;;  %v248_v28 = vpop.f32.mrb[3].mxu1 }
  0xf9   :  { %v335_v31 = vadd.f32 %v450_v17, %v216_v27  ;;  %v343_v32 = vadd.f32 %v450_v17, %v248_v28 }
  0xfa   :  { %v491_v33 = vpack.c.bf16 %v337_v25, %v336_v23  ;;  %v511_v34 = vpack.c.bf16 %v345_v26, %v344_v24 }
  0xfb   :  { %v486_v35 = vpack.c.bf16 %v335_v31, %v334_v29  ;;  %v506_v36 = vpack.c.bf16 %v343_v32, %v342_v30 }
  0xfc   :  { %523 = vst [vmem:[%s708_s3 + $0x8] sm:$0xff] %v491_v33   ;;  %527 = vst [vmem:[%s708_s3 + $0x28] sm:$0xff] %v511_v34  }
  0xfd   :  { %487 = vst [vmem:[%s708_s3] sm:$0xff] %v486_v35   ;;  %526 = vst [vmem:[%s708_s3 + $0x20] sm:$0xff] %v506_v36   ;;  %v568_v37 = vpop.f32.mrb[4].mxu0  ;;  %v576_v38 = vpop.f32.mrb[4].mxu1 }
  0xfe   :  { %v229_v39 = vpop.f32.mrb[5].mxu0  ;;  %v261_v40 = vpop.f32.mrb[5].mxu1  ;;  %v340_v43 = vadd.f32 %v568_v37, %v450_v17  ;;  %v348_v44 = vadd.f32 %v576_v38, %v450_v17 }
  0xff   :  { %v569_v41 = vpop.f32.mrb[6].mxu0  ;;  %v577_v42 = vpop.f32.mrb[6].mxu1  ;;  %v338_v49 = vadd.f32 %v450_v17, %v229_v39  ;;  %v346_v50 = vadd.f32 %v450_v17, %v261_v40 }
 0x100   :  { %v341_v45 = vadd.f32 %v569_v41, %v450_v17  ;;  %v349_v46 = vadd.f32 %v577_v42, %v450_v17  ;;  %v232_v47 = vpop.f32.mrb[7].mxu0  ;;  %v264_v48 = vpop.f32.mrb[7].mxu1 }
 0x101   :  { %v339_v51 = vadd.f32 %v450_v17, %v232_v47  ;;  %v347_v52 = vadd.f32 %v450_v17, %v264_v48 }
 0x102   :  { %v501_v53 = vpack.c.bf16 %v341_v45, %v340_v43  ;;  %v521_v54 = vpack.c.bf16 %v349_v46, %v348_v44 }
 0x103   :  { %v496_v55 = vpack.c.bf16 %v339_v51, %v338_v49  ;;  %v516_v56 = vpack.c.bf16 %v347_v52, %v346_v50 }
 0x104   :  { %525 = vst [vmem:[%s708_s3 + $0x18] sm:$0xff] %v501_v53   ;;  %529 = vst [vmem:[%s708_s3 + $0x38] sm:$0xff] %v521_v54  }
 0x105   :  { %524 = vst [vmem:[%s708_s3 + $0x10] sm:$0xff] %v496_v55   ;;  %528 = vst [vmem:[%s708_s3 + $0x30] sm:$0xff] %v516_v56  }

// kernel: basic_block_forward.5
= control target key start
LH: loop header
LB: loop body
LE: loop exit
PB: predicated region body
PF: predicated region fallthrough
CT: control target
= control target key end

     0   :  { %s739_s1 = inlined_call_operand.vmem [shape: bf16[128,128], index: 1, kind: input, shape index: {}]   ;;  %s740_s0 = inlined_call_operand.vmem [shape: bf16[128,128], index: 0, kind: input, shape index: {}]   ;;  %s741_s3 = inlined_call_operand.vmem [shape: bf16[128,128], index: 3, kind: input, shape index: {}]   ;;  %s742_s2 = inlined_call_operand.vmem [shape: f32[1,128], index: 2, kind: input, shape index: {}]   ;;  %s743_s4 = inlined_call_operand.vmem [shape: f32[128,128], index: 4, kind: output, shape index: {}]  }
   0x1   :  { %v557_v0 = vld [vmem:[%s739_s1] sm:$0xff]   ;;  %v558_v1 = vld [vmem:[%s739_s1 + $0x8] sm:$0xff]   ;;  %v559_v2 = vld [vmem:[%s739_s1 + $0x10] sm:$0xff]  }
   0x2   :  { %509 = vmatprep.subr.bf16.mxu0 %v557_v0  ;;  %541 = vmatprep.subr.bf16.mxu1 %v557_v0  ;;  %v560_v3 = vld [vmem:[%s739_s1 + $0x18] sm:$0xff]   ;;  %v565_v4 = vld [vmem:[%s740_s0] sm:$0xff]   ;;  %v562_v7 = vld [vmem:[%s739_s1 + $0x28] sm:$0xff]  }
   0x3   :  { %510 = vmatpush3.bf16.msra.mxu0 %v557_v0  ;;  %549 = vmatpush3.bf16.msra.mxu1 %v557_v0  ;;  %v566_v5 = vld [vmem:[%s740_s0 + $0x20] sm:$0xff]   ;;  %v563_v8 = vld [vmem:[%s739_s1 + $0x30] sm:$0xff]   ;;  %v564_v9 = vld [vmem:[%s739_s1 + $0x38] sm:$0xff]  }
   0x4   :  { %511 = vmatprep.subr.bf16.mxu0 %v558_v1  ;;  %542 = vmatprep.subr.bf16.mxu1 %v558_v1  ;;  %v561_v6 = vld [vmem:[%s739_s1 + $0x20] sm:$0xff]   ;;  %v567_v10 = vld [vmem:[%s740_s0 + $0x8] sm:$0xff]   ;;  %v569_v12 = vld [vmem:[%s740_s0 + $0x10] sm:$0xff]  }
   0x5   :  { %525 = vmatprep.mubr.bf16.mxu0 %v565_v4  ;;  %533 = vmatprep.mubr.bf16.mxu1 %v566_v5  ;;  %v568_v11 = vld [vmem:[%s740_s0 + $0x28] sm:$0xff]   ;;  %v570_v13 = vld [vmem:[%s740_s0 + $0x30] sm:$0xff]   ;;  %v571_v14 = vld [vmem:[%s740_s0 + $0x18] sm:$0xff]  }
   0x6   :  { %v572_v15 = vld [vmem:[%s740_s0 + $0x38] sm:$0xff]   ;;  %v486_v16 = vld [vmem:[%s741_s3 + $0x8] sm:$0xff]   ;;  %v455_v18 = vld [vmem:[%s741_s3] sm:$0xff]  }
   0x7   :  { %512 = vmatpush3.bf16.msra.mxu0 %v558_v1  ;;  %550 = vmatpush3.bf16.msra.mxu1 %v558_v1  ;;  %v490_v17 = vld [vmem:[%s741_s3 + $0x28] sm:$0xff]   ;;  %v489_v19 = vld [vmem:[%s741_s3 + $0x20] sm:$0xff]   ;;  %v460_v21 = vunpack.c.l.bf16 %v486_v16  ;;  %v456_v25 = vunpack.c.l.bf16 %v455_v18  ;;  %v461_v31 = vunpack.c.h.bf16 %v486_v16  ;;  %v457_v37 = vunpack.c.h.bf16 %v455_v18  ;;  %v488_v49 = vld [vmem:[%s741_s3 + $0x18] sm:$0xff]  }
   0x8   :  { %513 = vmatprep.subr.bf16.mxu0 %v559_v2  ;;  %543 = vmatprep.subr.bf16.mxu1 %v559_v2  ;;  %v661_v20 = vld [vmem:[%s742_s2] ss:$0 sm:$0xff]  ;;  %v476_v22 = vunpack.c.l.bf16 %v490_v17  ;;  %v472_v26 = vunpack.c.l.bf16 %v489_v19  ;;  %v477_v32 = vunpack.c.h.bf16 %v490_v17  ;;  %v473_v38 = vunpack.c.h.bf16 %v489_v19  ;;  %v492_v50 = vld [vmem:[%s741_s3 + $0x38] sm:$0xff]   ;;  %v487_v55 = vld [vmem:[%s741_s3 + $0x10] sm:$0xff]  }
   0x9   :  { %v491_v56 = vld [vmem:[%s741_s3 + $0x30] sm:$0xff]   ;;  %v468_v63 = vunpack.c.l.bf16 %v488_v49  ;;  %v484_v0 = vunpack.c.l.bf16 %v492_v50  ;;  %v464_v5 = vunpack.c.l.bf16 %v487_v55  ;;  %v465_v17 = vunpack.c.h.bf16 %v487_v55 }
   0xa   :  { %v481_v18 = vunpack.c.h.bf16 %v491_v56 }
   0xb   :  { %514 = vmatpush3.bf16.msra.mxu0 %v559_v2  ;;  %551 = vmatpush3.bf16.msra.mxu1 %v559_v2 }
   0xc   :  { %515 = vmatprep.subr.bf16.mxu0 %v560_v3  ;;  %544 = vmatprep.subr.bf16.mxu1 %v560_v3 }
   0xf   :  { %516 = vmatpush3.bf16.msra.mxu0 %v560_v3  ;;  %552 = vmatpush3.bf16.msra.mxu1 %v560_v3 }
  0x10   :  { %517 = vmatprep.subr.bf16.mxu0 %v561_v6  ;;  %545 = vmatprep.subr.bf16.mxu1 %v561_v6 }
  0x13   :  { %518 = vmatpush3.bf16.msra.mxu0 %v561_v6  ;;  %553 = vmatpush3.bf16.msra.mxu1 %v561_v6  ;;  %v480_v6 = vunpack.c.l.bf16 %v491_v56 }
  0x14   :  { %519 = vmatprep.subr.bf16.mxu0 %v562_v7  ;;  %546 = vmatprep.subr.bf16.mxu1 %v562_v7 }
  0x17   :  { %520 = vmatpush3.bf16.msra.mxu0 %v562_v7  ;;  %554 = vmatpush3.bf16.msra.mxu1 %v562_v7 }
  0x18   :  { %521 = vmatprep.subr.bf16.mxu0 %v563_v8  ;;  %547 = vmatprep.subr.bf16.mxu1 %v563_v8 }
  0x1b   :  { %522 = vmatpush3.bf16.msra.mxu0 %v563_v8  ;;  %555 = vmatpush3.bf16.msra.mxu1 %v563_v8 }
  0x1c   :  { %523 = vmatprep.subr.bf16.mxu0 %v564_v9  ;;  %548 = vmatprep.subr.bf16.mxu1 %v564_v9 }
  0x1f   :  { %524 = vmatpush3.bf16.msra.mxu0 %v564_v9  ;;  %556 = vmatpush3.bf16.msra.mxu1 %v564_v9 }
  0x22   :  { %526 = vmatmul.mubr.bf16.vlgmr.msra.gmra.mrb[0].mxu0 %v567_v10  ;;  %534 = vmatmul.mubr.bf16.vlgmr.msra.gmra.mrb[0].mxu1 %v568_v11  ;;  %v469_v11 = vunpack.c.h.bf16 %v488_v49 }
  0x23   :  { %529 = vmatprep.mubr.bf16.mxu0 %v569_v12  ;;  %537 = vmatprep.mubr.bf16.mxu1 %v570_v13  ;;  %v485_v12 = vunpack.c.h.bf16 %v492_v50 }
  0x2a   :  { %530 = vmatmul.mubr.bf16.gmra.mrb[4].mxu0 %v571_v14  ;;  %538 = vmatmul.mubr.bf16.gmra.mrb[4].mxu1 %v572_v15 }
  0xf5   :  { %v527_v23 = vpop.f32.mrb[0].mxu0  ;;  %v535_v24 = vpop.f32.mrb[0].mxu1 }
  0xf6   :  { %v339_v27 = vadd.f32 %v527_v23, %v661_v20  ;;  %v347_v28 = vadd.f32 %v535_v24, %v661_v20  ;;  %v216_v29 = vpop.f32.mrb[1].mxu0  ;;  %v248_v30 = vpop.f32.mrb[1].mxu1 }
  0xf7   :  { %v337_v33 = vadd.f32 %v661_v20, %v216_v29  ;;  %v345_v34 = vadd.f32 %v661_v20, %v248_v30  ;;  %v528_v35 = vpop.f32.mrb[2].mxu0  ;;  %v536_v36 = vpop.f32.mrb[2].mxu1 }
  0xf8   :  { %v387_v39 = vadd.f32 %v460_v21, %v339_v27  ;;  %v395_v40 = vadd.f32 %v476_v22, %v347_v28  ;;  %v340_v41 = vadd.f32 %v528_v35, %v661_v20  ;;  %v348_v42 = vadd.f32 %v536_v36, %v661_v20  ;;  %v219_v43 = vpop.f32.mrb[3].mxu0  ;;  %v251_v44 = vpop.f32.mrb[3].mxu1 }
  0xf9   :  { %v385_v45 = vadd.f32 %v456_v25, %v337_v33  ;;  %v393_v46 = vadd.f32 %v472_v26, %v345_v34  ;;  %v338_v47 = vadd.f32 %v661_v20, %v219_v43  ;;  %v346_v48 = vadd.f32 %v661_v20, %v251_v44 }
  0xfa   :  { %v403_v51 = vmax.f32 %v387_v39, 0.0  ;;  %v411_v52 = vmax.f32 %v395_v40, 0.0  ;;  %v388_v53 = vadd.f32 %v461_v31, %v340_v41  ;;  %v396_v54 = vadd.f32 %v477_v32, %v348_v42 }
  0xfb   :  { %v401_v57 = vmax.f32 %v385_v45, 0.0  ;;  %v409_v58 = vmax.f32 %v393_v46, 0.0  ;;  %v386_v59 = vadd.f32 %v457_v37, %v338_v47  ;;  %v394_v60 = vadd.f32 %v473_v38, %v346_v48 }
  0xfc   :  { %419 = vst [vmem:[%s743_s4 + $0x10] sm:$0xff] %v403_v51  ;;  %427 = vst [vmem:[%s743_s4 + $0x50] sm:$0xff] %v411_v52  ;;  %v404_v61 = vmax.f32 %v388_v53, 0.0  ;;  %v412_v62 = vmax.f32 %v396_v54, 0.0 }
  0xfd   :  { %417 = vst [vmem:[%s743_s4] sm:$0xff] %v401_v57  ;;  %425 = vst [vmem:[%s743_s4 + $0x40] sm:$0xff] %v409_v58  ;;  %v402_v1 = vmax.f32 %v386_v59, 0.0  ;;  %v410_v2 = vmax.f32 %v394_v60, 0.0  ;;  %v531_v3 = vpop.f32.mrb[4].mxu0  ;;  %v539_v4 = vpop.f32.mrb[4].mxu1 }
  0xfe   :  { %420 = vst [vmem:[%s743_s4 + $0x18] sm:$0xff] %v404_v61  ;;  %428 = vst [vmem:[%s743_s4 + $0x58] sm:$0xff] %v412_v62  ;;  %v343_v7 = vadd.f32 %v531_v3, %v661_v20  ;;  %v351_v8 = vadd.f32 %v539_v4, %v661_v20  ;;  %v232_v9 = vpop.f32.mrb[5].mxu0  ;;  %v264_v10 = vpop.f32.mrb[5].mxu1 }
  0xff   :  { %418 = vst [vmem:[%s743_s4 + $0x8] sm:$0xff] %v402_v1  ;;  %426 = vst [vmem:[%s743_s4 + $0x48] sm:$0xff] %v410_v2  ;;  %v341_v13 = vadd.f32 %v661_v20, %v232_v9  ;;  %v349_v14 = vadd.f32 %v661_v20, %v264_v10  ;;  %v532_v15 = vpop.f32.mrb[6].mxu0  ;;  %v540_v16 = vpop.f32.mrb[6].mxu1 }
 0x100   :  { %v391_v19 = vadd.f32 %v468_v63, %v343_v7  ;;  %v399_v21 = vadd.f32 %v484_v0, %v351_v8  ;;  %v344_v22 = vadd.f32 %v532_v15, %v661_v20  ;;  %v352_v23 = vadd.f32 %v540_v16, %v661_v20  ;;  %v235_v24 = vpop.f32.mrb[7].mxu0  ;;  %v267_v25 = vpop.f32.mrb[7].mxu1 }
 0x101   :  { %v389_v26 = vadd.f32 %v464_v5, %v341_v13  ;;  %v397_v27 = vadd.f32 %v480_v6, %v349_v14  ;;  %v342_v28 = vadd.f32 %v661_v20, %v235_v24  ;;  %v350_v29 = vadd.f32 %v661_v20, %v267_v25 }
 0x102   :  { %v407_v30 = vmax.f32 %v391_v19, 0.0  ;;  %v415_v31 = vmax.f32 %v399_v21, 0.0  ;;  %v392_v32 = vadd.f32 %v469_v11, %v344_v22  ;;  %v400_v33 = vadd.f32 %v485_v12, %v352_v23 }
 0x103   :  { %v405_v34 = vmax.f32 %v389_v26, 0.0  ;;  %v413_v35 = vmax.f32 %v397_v27, 0.0  ;;  %v390_v36 = vadd.f32 %v465_v17, %v342_v28  ;;  %v398_v37 = vadd.f32 %v481_v18, %v350_v29 }
 0x104   :  { %423 = vst [vmem:[%s743_s4 + $0x30] sm:$0xff] %v407_v30  ;;  %431 = vst [vmem:[%s743_s4 + $0x70] sm:$0xff] %v415_v31  ;;  %v408_v38 = vmax.f32 %v392_v32, 0.0  ;;  %v416_v39 = vmax.f32 %v400_v33, 0.0 }
 0x105   :  { %421 = vst [vmem:[%s743_s4 + $0x20] sm:$0xff] %v405_v34  ;;  %429 = vst [vmem:[%s743_s4 + $0x60] sm:$0xff] %v413_v35  ;;  %v406_v20 = vmax.f32 %v390_v36, 0.0  ;;  %v414_v40 = vmax.f32 %v398_v37, 0.0 }
 0x106   :  { %424 = vst [vmem:[%s743_s4 + $0x38] sm:$0xff] %v408_v38  ;;  %432 = vst [vmem:[%s743_s4 + $0x78] sm:$0xff] %v416_v39 }
 0x107   :  { %422 = vst [vmem:[%s743_s4 + $0x28] sm:$0xff] %v406_v20  ;;  %430 = vst [vmem:[%s743_s4 + $0x68] sm:$0xff] %v414_v40 }

</bundles_post_ra>
